<compile_context>
chip_gen: v6e
topology: v6e:2x2x1
jax: 0.10.0
libtpu: 0.0.40
codegen_flags: <defaults>
</compile_context>

<pallas_src>
import jax
import jax.numpy as jnp
from jax.experimental import pallas as pl
from jax.experimental.pallas import tpu as pltpu

# ----- synthetic config (small, consistent with the module) -----
ENC_HIDDEN = 24
VRNN_HIDDEN = 8
Z_INPUT = ENC_HIDDEN + VRNN_HIDDEN      # encoder_hidden_total_size + vrnn_hidden_size = 32
Z_LOGITS = 16                           # z_logits_dim (gumbel => projection out = Z_LOGITS)
COND_Z_LOGITS = 16                      # cond_z_logits_dim (input to prior FFNet)
PRIOR_FF = 32                           # prior_ff_sizes[-1]
GUMBEL_TMP = 0.5                        # gumbel_softmax_tmp
INV_TMP = 1.0 / GUMBEL_TMP

BATCH = 8
TIMESTEPS = 4                           # amortize the launch over T timesteps

S1_IN = Z_INPUT + COND_Z_LOGITS         # 48: packed activation width
S1_OUT = Z_LOGITS + PRIOR_FF            # 48: block-diagonal stage-1 output width
OUT_W = 4 * Z_LOGITS                    # 64: packed output slab width
ROW_TILE = 8                            # rows per grid step (sublane-aligned)


def _softmax_pair(logits):
    """Return (softmax(logits), softmax(logits / GUMBEL_TMP)) sharing max/exp."""
    m = jnp.max(logits, axis=-1, keepdims=True)          # XLU reduce, done once
    e = jnp.exp(logits - m)                               # EUP exp, done once
    plain = e / jnp.sum(e, axis=-1, keepdims=True)
    if INV_TMP == 2.0:
        # exp((x - m) / tmp) == exp(x - m)^2 exactly when 1/tmp == 2; the
        # common shift 2m cancels in the normalization.
        e_t = e * e
    else:  # static Python branch; general fallback
        e_t = jnp.exp((logits - m) * jnp.float32(INV_TMP))
    tempered = e_t / jnp.sum(e_t, axis=-1, keepdims=True)
    return plain, tempered


def znet_kernel(act_ref, w1aug_ref, w2aug_ref, out_ref):
    act = act_ref[...]                                    # [ROW_TILE, 48] = [x | zprev]

    w1aug = w1aug_ref[...]                                # [49, 48]
    w1blk = w1aug[0:S1_IN, :]                             # [48, 48] blockdiag(Wp, W1)
    b1blk = w1aug[S1_IN:S1_IN + 1, :]                     # [1, 48]  = [bp | b1]
    w2aug = w2aug_ref[...]                                # [33, 16]
    w2 = w2aug[0:PRIOR_FF, :]                             # [32, 16]
    b2 = w2aug[PRIOR_FF:PRIOR_FF + 1, :]                  # [1, 16]

    # Single block-diagonal MXU push: posterior_projection(x) and the
    # pre-activation of prior_net(z_previous) in one matmul.
    stage1 = jnp.dot(act, w1blk, preferred_element_type=jnp.float32) + b1blk  # [R, 48]
    post_logits = stage1[:, :Z_LOGITS]                    # [R, 16]
    h = jnp.tanh(stage1[:, Z_LOGITS:])                    # [R, 32] prior_net hidden

    # prior_projection(h): the only dependent second MXU push.
    prior_logits = jnp.dot(h, w2, preferred_element_type=jnp.float32) + b2    # [R, 16]

    q_z_samples, q_z = _softmax_pair(post_logits)
    p_z_samples, p_z = _softmax_pair(prior_logits)

    # Single lane-contiguous output slab: [q_z_samples | q_z | p_z_samples | p_z]
    out_ref[...] = jnp.concatenate([q_z_samples, q_z, p_z_samples, p_z], axis=-1)
    # TODO(synk): training-mode gumbel_softmax_sample / normal_sample branches
    # (stochastic) and the recurrent LSTMCell prior are not implemented here.


def pack_params(params):
    """Pack the 3 Linear layers into 2 weight slabs (bias as an extra row)."""
    w1blk = jnp.zeros((S1_IN, S1_OUT), jnp.float32)
    w1blk = w1blk.at[:Z_INPUT, :Z_LOGITS].set(params["wp"])
    w1blk = w1blk.at[Z_INPUT:, Z_LOGITS:].set(params["w1"])
    b1blk = jnp.concatenate([params["bp"], params["b1"]], axis=-1)   # [1, 48]
    w1aug = jnp.concatenate([w1blk, b1blk], axis=0)                  # [49, 48]
    w2aug = jnp.concatenate([params["w2"], params["b2"]], axis=0)    # [33, 16]
    return w1aug, w2aug


def znet_forward(x, z_previous, vrnn_hidden, w1aug, w2aug):
    # vrnn_hidden is unused in the non-recurrent prior path (matches PyTorch).
    del vrnn_hidden
    lead_shape = x.shape[:-1]                              # e.g. (T, B)
    x2 = x.reshape(-1, Z_INPUT)
    z2 = z_previous.reshape(-1, COND_Z_LOGITS)
    act = jnp.concatenate([x2, z2], axis=-1)               # [N, 48]
    n = act.shape[0]
    assert n % ROW_TILE == 0, "row count must be a multiple of ROW_TILE"

    slab = pl.pallas_call(
        znet_kernel,
        out_shape=jax.ShapeDtypeStruct((n, OUT_W), jnp.float32),
        grid=(n // ROW_TILE,),
        in_specs=[
            pl.BlockSpec((ROW_TILE, S1_IN), lambda i: (i, 0)),
            pl.BlockSpec(w1aug.shape, lambda i: (0, 0)),    # resident weights
            pl.BlockSpec(w2aug.shape, lambda i: (0, 0)),
        ],
        out_specs=pl.BlockSpec((ROW_TILE, OUT_W), lambda i: (i, 0)),
        compiler_params=pltpu.CompilerParams(
            dimension_semantics=("parallel",)),             # shard rows on v7x's 2 TCs
    )(act, w1aug, w2aug)

    def unpack(k):
        return slab[:, k * Z_LOGITS:(k + 1) * Z_LOGITS].reshape(*lead_shape, Z_LOGITS)

    q_z_samples, q_z, p_z_samples, p_z = (unpack(k) for k in range(4))
    return q_z_samples, q_z, p_z_samples, p_z


def _reference(x, z_previous, params):
    x2 = x.reshape(-1, Z_INPUT)
    z2 = z_previous.reshape(-1, COND_Z_LOGITS)
    post = x2 @ params["wp"] + params["bp"]
    h = jnp.tanh(z2 @ params["w1"] + params["b1"])
    prior = h @ params["w2"] + params["b2"]
    lead = x.shape[:-1]
    rs = lambda a: a.reshape(*lead, Z_LOGITS)
    return (rs(jax.nn.softmax(post, -1)),
            rs(jax.nn.softmax(post / GUMBEL_TMP, -1)),
            rs(jax.nn.softmax(prior, -1)),
            rs(jax.nn.softmax(prior / GUMBEL_TMP, -1)))


def init_params(key):
    ks = jax.random.split(key, 6)
    scale = 0.1
    # stored already transposed to [in, out]; biases as [1, out]
    return {
        "wp": scale * jax.random.normal(ks[0], (Z_INPUT, Z_LOGITS), jnp.float32),
        "bp": scale * jax.random.normal(ks[1], (1, Z_LOGITS), jnp.float32),
        "w1": scale * jax.random.normal(ks[2], (COND_Z_LOGITS, PRIOR_FF), jnp.float32),
        "b1": scale * jax.random.normal(ks[3], (1, PRIOR_FF), jnp.float32),
        "w2": scale * jax.random.normal(ks[4], (PRIOR_FF, Z_LOGITS), jnp.float32),
        "b2": scale * jax.random.normal(ks[5], (1, Z_LOGITS), jnp.float32),
    }


if __name__ == "__main__":
    key = jax.random.PRNGKey(0)
    k_x, k_z, k_h, k_p = jax.random.split(key, 4)

    # Amortized launch: all T timesteps of the (non-recurrent) ZNet in one call.
    x = jax.random.normal(k_x, (TIMESTEPS, BATCH, Z_INPUT), jnp.float32)
    z_previous = jax.random.normal(k_z, (TIMESTEPS, BATCH, COND_Z_LOGITS), jnp.float32)
    vrnn_hidden = jax.random.normal(k_h, (TIMESTEPS, BATCH, VRNN_HIDDEN), jnp.float32)
    params = init_params(k_p)
    w1aug, w2aug = pack_params(params)

    outs = znet_forward(x, z_previous, vrnn_hidden, w1aug, w2aug)
    outs = jax.block_until_ready(outs)

    refs = _reference(x, z_previous, params)
    for o, r in zip(outs, refs):
        assert o.shape == r.shape
        assert jnp.allclose(o, r, atol=1e-5, rtol=1e-5), "mismatch vs reference"

    print("KERNEL_OK")
</pallas_src>

<mosaic_0001>
module attributes {stable_mosaic.version = 11 : i64} {
  func.func @znet_kernel(%arg0: i32, %arg1: memref<8x48xf32, #tpu.memory_space<vmem>>, %arg2: memref<49x48xf32, #tpu.memory_space<vmem>>, %arg3: memref<33x16xf32, #tpu.memory_space<vmem>>, %arg4: memref<8x64xf32, #tpu.memory_space<vmem>>) attributes {dimension_semantics = [#tpu.dimension_semantics<parallel>], iteration_bounds = array<i64: 4>, scalar_prefetch = 0 : i64, scratch_operands = 0 : i64, tpu.core_type = #tpu.core_type<tc>, window_params = [{transform_indices = @transform_0, window_bounds = array<i64: 8, 48>}, {pipeline_mode = #tpu.pipeline_mode<synchronous>, transform_indices = @transform_1, window_bounds = array<i64: 49, 48>}, {pipeline_mode = #tpu.pipeline_mode<synchronous>, transform_indices = @transform_2, window_bounds = array<i64: 33, 16>}, {transform_indices = @transform_3, window_bounds = array<i64: 8, 64>}]} {
    %c0 = arith.constant 0 : index
    %c0_0 = arith.constant 0 : index
    %0 = vector.load %arg1[%c0, %c0_0] : memref<8x48xf32, #tpu.memory_space<vmem>>, vector<8x48xf32>
    %c0_1 = arith.constant 0 : index
    %c0_2 = arith.constant 0 : index
    %1 = vector.load %arg2[%c0_1, %c0_2] : memref<49x48xf32, #tpu.memory_space<vmem>>, vector<49x48xf32>
    %2 = vector.extract_strided_slice %1 {offsets = [0, 0], sizes = [48, 48], strides = [1, 1]} : vector<49x48xf32> to vector<48x48xf32>
    %3 = vector.extract_strided_slice %1 {offsets = [48, 0], sizes = [1, 48], strides = [1, 1]} : vector<49x48xf32> to vector<1x48xf32>
    %c0_3 = arith.constant 0 : index
    %c0_4 = arith.constant 0 : index
    %4 = vector.load %arg3[%c0_3, %c0_4] : memref<33x16xf32, #tpu.memory_space<vmem>>, vector<33x16xf32>
    %5 = vector.extract_strided_slice %4 {offsets = [0, 0], sizes = [32, 16], strides = [1, 1]} : vector<33x16xf32> to vector<32x16xf32>
    %6 = vector.extract_strided_slice %4 {offsets = [32, 0], sizes = [1, 16], strides = [1, 1]} : vector<33x16xf32> to vector<1x16xf32>
    %cst = arith.constant dense<0.000000e+00> : vector<8x48xf32>
    %7 = tpu.matmul %0, %2, %cst {dimension_numbers = #tpu.dot_dimension_numbers<[1], [0], [0], [1], [0, 0, 1, 1], [], []>} : vector<8x48xf32>, vector<48x48xf32>, vector<8x48xf32> -> vector<8x48xf32>
    %8 = vector.broadcast %3 : vector<1x48xf32> to vector<8x48xf32>
    %9 = arith.addf %7, %8 : vector<8x48xf32>
    %10 = vector.extract_strided_slice %9 {offsets = [0, 0], sizes = [8, 16], strides = [1, 1]} : vector<8x48xf32> to vector<8x16xf32>
    %11 = vector.extract_strided_slice %9 {offsets = [0, 16], sizes = [8, 32], strides = [1, 1]} : vector<8x48xf32> to vector<8x32xf32>
    %12 = math.tanh %11 : vector<8x32xf32>
    %cst_5 = arith.constant dense<0.000000e+00> : vector<8x16xf32>
    %13 = tpu.matmul %12, %5, %cst_5 {dimension_numbers = #tpu.dot_dimension_numbers<[1], [0], [0], [1], [0, 0, 1, 1], [], []>} : vector<8x32xf32>, vector<32x16xf32>, vector<8x16xf32> -> vector<8x16xf32>
    %14 = vector.broadcast %6 : vector<1x16xf32> to vector<8x16xf32>
    %15 = arith.addf %13, %14 : vector<8x16xf32>
    %cst_6 = arith.constant dense<0xFF800000> : vector<8xf32>
    %16 = vector.multi_reduction <maximumf>, %10, %cst_6 [1] : vector<8x16xf32> to vector<8xf32>
    %17 = vector.shape_cast %16 : vector<8xf32> to vector<8x1xf32>
    %18 = vector.broadcast %17 : vector<8x1xf32> to vector<8x16xf32>
    %19 = arith.subf %10, %18 : vector<8x16xf32>
    %20 = math.exp %19 : vector<8x16xf32>
    %cst_7 = arith.constant dense<0.000000e+00> : vector<8xf32>
    %21 = vector.multi_reduction <add>, %20, %cst_7 [1] : vector<8x16xf32> to vector<8xf32>
    %22 = vector.shape_cast %21 : vector<8xf32> to vector<8x1xf32>
    %23 = vector.broadcast %22 : vector<8x1xf32> to vector<8x16xf32>
    %24 = arith.divf %20, %23 : vector<8x16xf32>
    %25 = arith.mulf %20, %20 : vector<8x16xf32>
    %cst_8 = arith.constant dense<0.000000e+00> : vector<8xf32>
    %26 = vector.multi_reduction <add>, %25, %cst_8 [1] : vector<8x16xf32> to vector<8xf32>
    %27 = vector.shape_cast %26 : vector<8xf32> to vector<8x1xf32>
    %28 = vector.broadcast %27 : vector<8x1xf32> to vector<8x16xf32>
    %29 = arith.divf %25, %28 : vector<8x16xf32>
    %cst_9 = arith.constant dense<0xFF800000> : vector<8xf32>
    %30 = vector.multi_reduction <maximumf>, %15, %cst_9 [1] : vector<8x16xf32> to vector<8xf32>
    %31 = vector.shape_cast %30 : vector<8xf32> to vector<8x1xf32>
    %32 = vector.broadcast %31 : vector<8x1xf32> to vector<8x16xf32>
    %33 = arith.subf %15, %32 : vector<8x16xf32>
    %34 = math.exp %33 : vector<8x16xf32>
    %cst_10 = arith.constant dense<0.000000e+00> : vector<8xf32>
    %35 = vector.multi_reduction <add>, %34, %cst_10 [1] : vector<8x16xf32> to vector<8xf32>
    %36 = vector.shape_cast %35 : vector<8xf32> to vector<8x1xf32>
    %37 = vector.broadcast %36 : vector<8x1xf32> to vector<8x16xf32>
    %38 = arith.divf %34, %37 : vector<8x16xf32>
    %39 = arith.mulf %34, %34 : vector<8x16xf32>
    %cst_11 = arith.constant dense<0.000000e+00> : vector<8xf32>
    %40 = vector.multi_reduction <add>, %39, %cst_11 [1] : vector<8x16xf32> to vector<8xf32>
    %41 = vector.shape_cast %40 : vector<8xf32> to vector<8x1xf32>
    %42 = vector.broadcast %41 : vector<8x1xf32> to vector<8x16xf32>
    %43 = arith.divf %39, %42 : vector<8x16xf32>
    %44 = tpu.concatenate %24, %29, %38, %43 in 1 : vector<8x16xf32>, vector<8x16xf32>, vector<8x16xf32>, vector<8x16xf32> -> vector<8x64xf32>
    %c0_12 = arith.constant 0 : index
    %c0_13 = arith.constant 0 : index
    %45 = vector.load %arg4[%c0_12, %c0_13] : memref<8x64xf32, #tpu.memory_space<vmem>>, vector<8x64xf32>
    tpu.vector_store %arg4[%c0_12, %c0_13], %44 {strides = array<i32>} : memref<8x64xf32, #tpu.memory_space<vmem>>, vector<8x64xf32>,
    return
  }
  func.func @transform_0(%arg0: i32) -> (i32, i32) {
    %c0_i32 = arith.constant 0 : i32
    %c0_i32_0 = arith.constant 0 : i32
    return %arg0, %c0_i32 : i32, i32
  }
  func.func @transform_1(%arg0: i32) -> (i32, i32) {
    %c0_i32 = arith.constant 0 : i32
    %c0_i32_0 = arith.constant 0 : i32
    %c0_i32_1 = arith.constant 0 : i32
    return %c0_i32, %c0_i32_0 : i32, i32
  }
  func.func @transform_2(%arg0: i32) -> (i32, i32) {
    %c0_i32 = arith.constant 0 : i32
    %c0_i32_0 = arith.constant 0 : i32
    %c0_i32_1 = arith.constant 0 : i32
    return %c0_i32, %c0_i32_0 : i32, i32
  }
  func.func @transform_3(%arg0: i32) -> (i32, i32) {
    %c0_i32 = arith.constant 0 : i32
    %c0_i32_0 = arith.constant 0 : i32
    return %arg0, %c0_i32 : i32, i32
  }
}

</mosaic_0001>

<bundles_post_ra>
// kernel: tpu_custom_call.1
= control target key start
LH: loop header
LB: loop body
LE: loop exit
PB: predicated region body
PF: predicated region fallthrough
CT: control target
= control target key end

     0   :  { %8 = vsyncpa [#allocation3], 0  ;;  %s803_s0 = inlined_call_operand.vmem [shape: f32[32,48], index: 0, kind: input, shape index: {}]   ;;  %s804_s1 = inlined_call_operand.vmem [shape: f32[49,48], index: 1, kind: input, shape index: {}]   ;;  %s805_s2 = inlined_call_operand.vmem [shape: f32[33,16], index: 2, kind: input, shape index: {}]   ;;  %s806_s3 = inlined_call_operand.hbm [shape: f32[32,64], index: 3, kind: output, shape index: {}]  }
   0x1   :  { %10 = vsyncpa [#allocation3 + $0x1], 0  ;;  %s663_s12 = smov 0   ;;  %s665_s13 = smov 0  }
   0x2   :  { %s667_s14 = smov 0   ;;  %s669_s15 = smov 0  }
   0x3 LB: > { %s684_s16 = sadd.s32 4294967295, %s634_s15   ;;  %s463_s17 = sadd.s32 4294967294, %s634_s15   ;;  %s634_s15 = sphi %s669_s15, %s812_s15   ;;  %s630_s14 = sphi %s667_s14, %s811_s14   ;;  %s626_s13 = sphi %s665_s13, %s810_s13   ;;  %s622_s12 = sphi %s663_s12, %s809_s12  }
   0x4   : > { %s688_s18 = sadd.s32 1, %s634_s15   ;;  %s91_s19 = sadd.s32 1, %s630_s14 }
   0x5   : > { %s88_s20 = ssub.s32 %s634_s15, %s688_s18  ;;  %p101_p0 = scmp.ne.s32.totalorder %s630_s14, %s626_s13 }
   0x6   : > { %p89_p1 = scmp.eq.s32.totalorder %s88_s20, 0  ;;  %p102_p2 = scmp.eq.s32.totalorder %s684_s16, 3 }
   0x7   : > { %p107_p3 = scmp.ne.s32.totalorder %s626_s13, %s622_s12  ;;  %p108_p4 = scmp.eq.s32.totalorder %s463_s17, 3 }
   0x8   : > { %s699_s21 = scalar_select %p89_p1, %s630_s14, %s91_s19  }
   0x9   : > { %p701_p5 = por %p102_p2, %p101_p0  ;;  %p705_p6 = por %p108_p4, %p107_p3 }
   0xa   : > { %p466_p7 = scmp.ge.s32.totalorder %s634_s15, 1  ;;  %p139_p8 = scmp.lt.s32.totalorder %s634_s15, 5 }
   0xc   : > { %p140_p9 = pnand %p466_p7, %p139_p8 }
   0xd   : > { %p162_p10 = scmp.lt.s32.totalorder (!%p140_p9), %s684_s16, 3  ;;  %s638_s6 = smov (!%p140_p9), 112  }
   0xe   : > { %143 = sbr.rel (%p140_p9) target bundleno = 996 (0x3e4), region = 32  ;;  %s639_s9 = smov (!%p140_p9), 16  }
   0xf   : > { %s640_s10 = smov (!%p140_p9), 32   ;;  %s159_s17 = sand.u32 (!%p140_p9), 1, %s626_s13  }
  0x10   : > { %s467_s19 = sshll.u32 (!%p140_p9), %s159_s17, 3  ;;  %s474_s20 = sshll.u32 (!%p140_p9), %s684_s16, 7 }
  0x11   : > { %s161_s24 = scalar_lea.vmem (!%p140_p9), [#allocation2], %s467_s19  ;;  %s391_s29 = scalar_lea.sflag (!%p140_p9), [#allocation3], %s159_s17 }
  0x12   : > { %s404_s25 = sshll.u32 (!%p140_p9), %s161_s24, 4  ;;  %s405_s25 = int_to_ptr.vmem [resolvable:$true] %s404_s25 }
  0x13   : > { %v172_v0 = vld [vmem:[%s804_s1 + $0x28] sm:$0xff]  ;;  %v636_v1 = vmov 0.0   ;;  %v171_v2 = vld [vmem:[%s804_s1 + $0x20] sm:$0xff]  ;;  %vm637_vm0 = vmmov 0   ;;  %s163_s28 = scalar_select %p162_p10, %s684_s16, 3  ;;  %v170_v3 = vld [vmem:[%s804_s1 + $0x18] sm:$0xff] }
  0x14   : > { %489 = vmatprep.subr.mxu0 %v636_v1  ;;  %501 = vmatprep.mubr.msk.f32.mxu0 %vm637_vm0, %v636_v1  ;;  %v169_v4 = vld [vmem:[%s804_s1 + $0x10] sm:$0xff]  ;;  %v168_v5 = vld [vmem:[%s804_s1 + $0x8] sm:$0xff]  ;;  %v167_v6 = vld [vmem:[%s804_s1] sm:$0xff]  ;;  %vm183_vm1 = vcmask 392192   ;;  %vm338_vm2 = vcmask 130048   ;;  %vm265_vm3 = vcmask 261120  }
  0x15   : > { %490 = vmatpush3.msra.mxu0 %v172_v0  ;;  %504 = vmatprep.subr.mxu1 %v636_v1  ;;  %s468_s4 = sshll.u32 %s163_s28, 3  ;;  %v177_v8 = vld [vmem:[%s805_s2 + $0x18] sm:$0xff]  ;;  %v176_v9 = vld [vmem:[%s805_s2 + $0x10] sm:$0xff]  ;;  %v175_v10 = vld [vmem:[%s805_s2 + $0x8] sm:$0xff]  ;;  %vm388_vm4 = vcmask 523264   ;;  %s767_s28 = scalar_lea.hbm %s806_s3, %s474_s20 }
  0x16   : > { %491 = vmatprep.subr.mxu0 %v636_v1  ;;  %512 = vmatprep.mubr.msk.f32.mxu1 %vm637_vm0, %v636_v1  ;;  %s165_s11 = scalar_lea.vmem %s803_s0, %s468_s4  ;;  %v174_v11 = vld [vmem:[%s805_s2] sm:$0xff]  ;;  %v469_v12 = vld [vmem:[%s804_s1 + $0x30] ss:$0 sm:$0xff]  ;;  %s574_s30 = scalar_lea.vmem %s405_s25, 128 }
  0x17   : > { %492 = vmatpush3.msra.mxu0 %v171_v2  ;;  %v166_v7 = vld [vmem:[%s165_s11] sm:$0xff]  ;;  %505 = vmatpush3.msra.mxu1 %v177_v8  ;;  %s641_s11 = smov 48   ;;  %p575_p11 = scmp.ne.s32.totalorder %s405_s25, %s574_s30 }
  0x18   : > { %493 = vmatprep.subr.mxu0 %v636_v1  ;;  %506 = vmatprep.subr.mxu1 %v636_v1  ;;  %v471_v22 = vld [vmem:[%s805_s2 + $0x20] ss:$0 sm:$0xff]  ;;  %s642_s16 = smov [#allocation2]  }
  0x19   : > { %494 = vmatpush3.msra.mxu0 %v170_v3  ;;  %507 = vmatpush3.msra.mxu1 %v176_v9  ;;  %p576_p12 = pnand %p575_p11, %p701_p5  ;;  %s578_s4 = sshll.u32 %s642_s16, 4  ;;  %s579_s4 = int_to_ptr.vmem [resolvable:$false] %s578_s4 }
  0x1a   : > { %495 = vmatprep.subr.mxu0 %v636_v1  ;;  %508 = vmatprep.subr.mxu1 %v636_v1  ;;  %s580_s5 = scalar_lea.vmem %s579_s4, 256  ;;  %p581_p0 = scmp.lt.s32.totalorder %s405_s25, %s579_s4 }
  0x1b   : > { %496 = vmatpush3.msra.mxu0 %v169_v4  ;;  %509 = vmatpush3.msra.mxu1 %v175_v10  ;;  %p577_p13 = pneg %p576_p12  ;;  %p582_p1 = scmp.lt.s32.totalorder %s580_s5, %s574_s30 }
  0x1c   : > { %497 = vmatprep.subr.mxu0 %v636_v1  ;;  %510 = vmatprep.subr.mxu1 %v636_v1 }
  0x1d   : > { %498 = vmatpush3.msra.mxu0 %v168_v5  ;;  %511 = vmatpush3.msra.mxu1 %v174_v11  ;;  %p583_p2 = por %p582_p1, %p581_p0 }
  0x1e   : > { %499 = vmatprep.subr.mxu0 %v636_v1 }
  0x1f   : > { %500 = vmatpush3.msra.mxu0 %v167_v6  ;;  %p584_p3 = pnand %p583_p2, %p577_p13 }
  0x20   : > { %502 = vmatmul.mubr.msk.f32.vlgmr.msra.gmra.mxu0 %vm183_vm1, %v166_v7 }
  0xe0   : > { %v253_v13 = vpop.f32.mrf.mxu0 }
  0xe1   : > { %v254_v14 = vadd.f32 %v469_v12, %v253_v13 }
  0xe2   : > { %v503_v15 = vpop.f32.mrf.mxu0 }
  0xe3   : > { %560 = vtanh.f32 %v254_v14  ;;  %v339_v17 = vsel %vm338_vm2, %v254_v14, -inf }
  0xf0   : > { %v561_v16 = vpop.eup %560 }
  0xf1   : > { %263 = vrot.lane.b32.xlu0 %v561_v16, %s638_s6 }
 0x110   : > { %340 = vmax.xlane.f32.xlu0 %v339_v17 }
 0x163   : > { %v264_v18 = vpop.permute.xlu0 %263 }
 0x164   : > { %513 = vmatmul.mubr.msk.f32.vlgmr.msra.gmra.mxu1 %vm265_vm3, %v264_v18 }
 0x199   : > { %v341_v19 = vpop.xlane.xlu0 %340 }
 0x19a   : > { %v342_v20 = vsub.f32 %v254_v14, %v341_v19 }
 0x19c   : > { %v343_v21 = vmul.f32 1.442695, %v342_v20 }
 0x19e   : > { %562 = vpow2.f32 %v343_v21 }
 0x1ab   : > { %v563_v23 = vpop.eup %562 }
 0x1ac   : > { %v350_v28 = vmul.f32 %v563_v23, %v563_v23  ;;  %v345_v38 = vsel %vm338_vm2, %v563_v23, 0.0 }
 0x1ae   : > { %v351_v29 = vsel %vm338_vm2, %v350_v28, 0.0 }
 0x224   : > { %v334_v24 = vpop.f32.mrf.mxu1 }
 0x225   : > { %v335_v25 = vadd.f32 %v471_v22, %v334_v24 }
 0x226   : > { %v514_v26 = vpop.f32.mrf.mxu1 }
 0x227   : > { %v356_v27 = vsel %vm338_vm2, %v335_v25, -inf }
 0x228   : > { %357 = vmax.xlane.f32.xlu1 %v356_v27 }
 0x22c   : > { %352 = vadd.xlane.f32.xlu1 %v351_v29 }
 0x2b1   : > { %v358_v30 = vpop.xlane.xlu1 %357 }
 0x2b2   : > { %v359_v31 = vsub.f32 %v335_v25, %v358_v30 }
 0x2b4   : > { %v360_v32 = vmul.f32 1.442695, %v359_v31 }
 0x2b5   : > { %v353_v37 = vpop.xlane.xlu1 %352 }
 0x2b6   : > { %564 = vpow2.f32 %v360_v32 }
 0x2b7   : > { %566 = vrcp.f32 %v353_v37 }
 0x2c3   : > { %v565_v33 = vpop.eup %564 }
 0x2c4   : > { %v362_v34 = vsel %vm338_vm2, %v565_v33, 0.0  ;;  %v367_v35 = vmul.f32 %v565_v33, %v565_v33  ;;  %v567_v39 = vpop.eup %566 }
 0x2c5   : > { %363 = vadd.xlane.f32.xlu1 %v362_v34  ;;  %v355_v40 = vmul.f32 %v567_v39, %v350_v28 }
 0x2c6   : > { %v368_v36 = vsel %vm338_vm2, %v367_v35, 0.0 }
 0x2c9   : > { %369 = vadd.xlane.f32.xlu1 %v368_v36 }
 0x2cd   : > { %346 = vadd.xlane.f32.xlu1 %v345_v38 }
 0x2de   : > { %374 = vrot.lane.b32.xlu1 %v355_v40, %s639_s9 }
 0x34e   : > { %v364_v41 = vpop.xlane.xlu1 %363 }
 0x34f   : > { %568 = vrcp.f32 %v364_v41 }
 0x352   : > { %v370_v42 = vpop.xlane.xlu1 %369 }
 0x353   : > { %570 = vrcp.f32 %v370_v42 }
 0x356   : > { %v347_v47 = vpop.xlane.xlu1 %346 }
 0x357   : > { %572 = vrcp.f32 %v347_v47 }
 0x35a   : > { %v375_v50 = vpop.permute.xlu1 %374 }
 0x35c   : > { %v569_v43 = vpop.eup %568 }
 0x35d   : > { %v366_v44 = vmul.f32 %v569_v43, %v565_v33 }
 0x35f   : > { %378 = vrot.lane.b32.xlu0 %v366_v44, %s640_s10 }
 0x360   : > { %v571_v45 = vpop.eup %570 }
 0x361   : > { %v372_v46 = vmul.f32 %v571_v45, %v367_v35 }
 0x363   : > { %382 = vrot.lane.b32.xlu1 %v372_v46, %s641_s11 }
 0x364   : > { %v573_v48 = vpop.eup %572 }
 0x365   : > { %v349_v49 = vmul.f32 %v573_v48, %v563_v23 }
 0x367   : > { %v385_v52 = vsel %vm338_vm2, %v349_v49, %v375_v50 }
 0x3d1   : > { %v379_v51 = vpop.permute.xlu0 %378 }
 0x3d2   : > { %v386_v53 = vsel %vm265_vm3, %v385_v52, %v379_v51 }
 0x3d5   : > { %v383_v54 = vpop.permute.xlu1 %382 }
 0x3d6   : > { %v387_v55 = vsel %vm183_vm1, %v386_v53, %v383_v54 }
 0x3d7   : > { %389 = vst.msk [vmem:[%s161_s24] sm:$0xff] %vm388_vm4, %v387_v55 }
 0x3d8   : > { %587 = shalt.err (!%p584_p3)
}
 0x3d9   : > { %s588_s6 = scalar_lea.hbm %s767_s28, 128  ;;  %s592_s9 = scalar_lea.hbm %s806_s3, 512 }
 0x3da   : > { %p589_p4 = scmp.ne.s32.totalorder %s767_s28, %s588_s6  ;;  %p593_p9 = scmp.lt.s32.totalorder %s767_s28, %s806_s3 }
 0x3db   : > { %p594_p10 = scmp.lt.s32.totalorder %s592_s9, %s588_s6 }
 0x3dc   : > { %p590_p7 = pnand %p589_p4, %p701_p5 }
 0x3dd   : > { %p595_p11 = por %p594_p10, %p593_p9 }
 0x3de   : > { %p591_p8 = pneg %p590_p7 }
 0x3e0   : > { %p596_p12 = pnand %p595_p11, %p591_p8 }
 0x3e2   : > { %599 = shalt.err (!%p596_p12)
}
 0x3e3   : > { %515 = dma.vmem_to_hbm [thread:$0]  (%p701_p5), %s405_s25, 128, %s767_s28, %s391_s29  }
 0x3e4 PF: > { %p521_p13 = scmp.ge.s32.totalorder %s634_s15, 2  ;;  %s416_s17 = sand.u32 1, %s622_s12  }
 0x3e5   : > { %s417_s19 = scalar_lea.sflag [#allocation3], %s416_s17 }
 0x3e6   : > { %p518_p0 = pnand %p521_p13, %p705_p6 }
 0x3e8   : > { %p519_p1 = pneg %p518_p0 }
 0x3ea   : > { %617 = dma.done.wait (%p519_p1), %s417_s19, 128  }
 0x3eb   : > { %619 = vsyncadd (%p519_p1), %s417_s19, 4294967168  ;;  %p13_p2 = scmp.ge.s32.totalorder %s688_s18, 6   ;;  %s809_s12 = smov %s626_s13 }
 0x3ec   : > { %s810_s13 = smov %s630_s14  ;;  %s811_s14 = smov %s699_s21 }
 0x3ed   : > { %s812_s15 = smov %s688_s18  ;;  %15 = sbr.rel (!%p13_p2) target bundleno = 3 (0x3), region = 67 }
 0x3f2   :  { %422 = vsyncpa [#allocation3], 1 }
 0x3f3   :  { %424 = vsyncpa [#allocation3 + $0x1], 1 }

</bundles_post_ra>
